<compile_context>
chip_gen: v7x
topology: tpu7x:2x2x1
jax: 0.10.0
libtpu: 0.0.40
codegen_flags: <defaults>
</compile_context>

<pallas_src>
import functools

import jax
import jax.numpy as jnp
from jax.experimental import pallas as pl
from jax.experimental.pallas import tpu as pltpu


def _vmem_capacity_bytes():
    """Physical VMEM per core; conservative fallback if the query fails."""
    try:
        cap = int(pltpu.get_tpu_info().vmem_capacity_bytes)
        if cap > 0:
            return cap
    except Exception:
        pass
    # v7x has the smallest VMEM (64 MiB); a safe default for every generation.
    return 64 * 1024 * 1024


def _pick_pack_factor(rows, f):
    """Pack g consecutive rows into one lane row when F is small so DMAs and
    stores stay lane-dense. Prefer packed widths that are exact multiples of
    128 lanes; cap at 128 lanes so the block-diagonal reduction matmul stays
    cheap relative to HBM time on every generation (incl. v5e / v7x)."""
    if f >= 128 or f < 2:
        return 1
    gmax = min(rows, max(1, 128 // f))
    best = 1
    for g in range(2, gmax + 1):
        if rows % g == 0 and (g * f) % 128 == 0:
            best = g                      # largest lane-dense divisor wins
    if best > 1:
        return best
    # No 128-lane-dense divisor: still widen the row as much as rows allows.
    for g in range(gmax, 1, -1):
        if rows % g == 0:
            return g
    return 1


def _pick_row_tile(rows_p, lane_width, elem_bytes, align, vmem_budget):
    """Row tile sized for HBM streaming.

    Target ~8 MiB of input per grid step (amortizes the ~0.35us fixed per-step
    cost to a few percent on every generation), clamped so the double-buffered
    in/out blocks plus ~8 f32 full-tile intermediates fit the VMEM budget
    (matters most on v7x's 64 MiB VMEM). When the grid would be short, re-split
    into >=4 (ideally 8) steps so both v7x TensorCores get pipelined work, as
    long as each step still streams >= ~512 KiB of input.
    """
    row_in_bytes = lane_width * elem_bytes
    per_row_vmem = lane_width * (4 * elem_bytes + 8 * 4)
    cap_rows = max(align, (vmem_budget // per_row_vmem) // align * align)
    target_rows = max(align, ((8 << 20) // row_in_bytes) // align * align)
    tile = min(cap_rows, target_rows)
    if tile < rows_p and pl.cdiv(rows_p, tile) >= 4:
        return tile
    min_rows = pl.cdiv(512 << 10, row_in_bytes)
    for want in (8, 4):
        split = pl.cdiv(pl.cdiv(rows_p, want), align) * align
        if split < rows_p and split >= min_rows:
            return min(split, tile)
    return min(tile, rows_p)              # block == full extent is legal tiling


def _ln_rows_kernel(x_ref, a_ref, b_ref, o_ref, *, eps, n):
    """Generic path: one row per normalization group. x_ref: (tile, F)."""
    xf = x_ref[...].astype(jnp.float32)
    mean = jnp.sum(xf, axis=-1, keepdims=True) * (1.0 / n)
    diff = xf - mean
    var = jnp.sum(diff * diff, axis=-1, keepdims=True) * (1.0 / (n - 1))
    # Per-row exact reciprocal: one divide per row, tight numerical parity.
    inv = pl.reciprocal(jnp.sqrt(var) + eps, approx=False)    # (tile, 1)
    s = inv * a_ref[...].astype(jnp.float32)                  # (tile, F)
    o_ref[...] = (diff * s + b_ref[...].astype(jnp.float32)).astype(o_ref.dtype)


def _ln_packed_kernel(x_ref, a_ref, b_ref, d_ref, o_ref, *, eps, f):
    """Lane-packed path (F < 128): each packed row holds g = fp // F original
    rows. Segmented sums are computed on the otherwise-idle MXU as matmuls
    against a constant 0/1 block-diagonal matrix, which yields the per-segment
    result already broadcast across the segment's lanes."""
    xf = x_ref[...].astype(jnp.float32)                       # (tile, fp)
    d = d_ref[...]                                            # (fp, fp) f32 0/1
    sum_b = jnp.dot(xf, d, preferred_element_type=jnp.float32)
    mean_b = sum_b * (1.0 / f)
    diff = xf - mean_b
    sumsq_b = jnp.dot(diff * diff, d, preferred_element_type=jnp.float32)
    # Unbiased variance; eps added to the std (matches the PyTorch module).
    inv = pl.reciprocal(jnp.sqrt(sumsq_b * (1.0 / (f - 1))) + eps, approx=False)
    s = inv * a_ref[...].astype(jnp.float32)
    o_ref[...] = (diff * s + b_ref[...].astype(jnp.float32)).astype(o_ref.dtype)


def layer_norm(x, a_2, b_2, eps=1e-6):
    """LayerNorm over the last axis of x, matching the reference nn.Module
    (unbiased std over the last dim, eps added to the std)."""
    orig_shape = x.shape
    f = orig_shape[-1]
    assert a_2.shape == (f,) and b_2.shape == (f,)
    assert f >= 2, "unbiased std needs features >= 2"

    x2 = x.reshape(-1, f)
    rows = x2.shape[0]
    elem_bytes = x2.dtype.itemsize
    # Sub-32-bit dtypes pack rows along sublanes: align the row tile accordingly.
    align = {4: 8, 2: 16, 1: 32}.get(elem_bytes, 8)

    g = _pick_pack_factor(rows, f)
    fp = f * g
    rows_p = rows // g

    vmem_cap = _vmem_capacity_bytes()
    vmem_limit = int(vmem_cap * 3 // 4)
    tile = _pick_row_tile(rows_p, fp, elem_bytes, align, vmem_limit * 3 // 4)
    grid = (pl.cdiv(rows_p, tile),)        # no HBM-side padding / slicing

    x_p = x2.reshape(rows_p, fp)           # contiguous reshape: free
    if g > 1:
        a_p = jnp.tile(a_2, g).reshape(1, fp)
        b_p = jnp.tile(b_2, g).reshape(1, fp)
        seg = jnp.arange(fp, dtype=jnp.int32) // f
        dmat = (seg[:, None] == seg[None, :]).astype(jnp.float32)   # block-diag 0/1
        kern = functools.partial(_ln_packed_kernel, eps=float(eps), f=f)
        in_specs = [
            pl.BlockSpec((tile, fp), lambda i: (i, 0)),
            # Constant index_map -> gamma/beta/D fetched once and kept resident.
            pl.BlockSpec((1, fp), lambda i: (0, 0)),
            pl.BlockSpec((1, fp), lambda i: (0, 0)),
            pl.BlockSpec((fp, fp), lambda i: (0, 0)),
        ]
        args = (x_p, a_p, b_p, dmat)
    else:
        a_p = a_2.reshape(1, f)
        b_p = b_2.reshape(1, f)
        kern = functools.partial(_ln_rows_kernel, eps=float(eps), n=f)
        in_specs = [
            pl.BlockSpec((tile, fp), lambda i: (i, 0)),
            pl.BlockSpec((1, fp), lambda i: (0, 0)),
            pl.BlockSpec((1, fp), lambda i: (0, 0)),
        ]
        args = (x_p, a_p, b_p)

    out = pl.pallas_call(
        kern,
        out_shape=jax.ShapeDtypeStruct((rows_p, fp), x.dtype),
        grid_spec=pltpu.PrefetchScalarGridSpec(
            num_scalar_prefetch=0,
            grid=grid,
            in_specs=in_specs,
            out_specs=pl.BlockSpec((tile, fp), lambda i: (i, 0)),
        ),
        compiler_params=pltpu.CompilerParams(
            # TODO(synk): evaluate pltpu.CORE_PARALLEL on v7x if the plain
            # "parallel" axis does not shard across both TensorCores.
            dimension_semantics=("parallel",),
            # Raise the scoped VMEM limit (defaults: 16 MiB v5e / 32 MiB v6e,v7x)
            # so the bandwidth-sized row tile actually fits.
            vmem_limit_bytes=vmem_limit,
        ),
    )(*args)

    return out.reshape(orig_shape)


def _reference(x, a_2, b_2, eps):
    xf = x.astype(jnp.float32)
    mean = jnp.mean(xf, axis=-1, keepdims=True)
    std = jnp.std(xf, axis=-1, keepdims=True, ddof=1)
    return a_2.astype(jnp.float32) * (xf - mean) / (std + eps) + b_2.astype(jnp.float32)


if __name__ == "__main__":
    key = jax.random.PRNGKey(0)

    # --- main case (small hidden width -> lane-packed MXU-reduction path)
    batch, seq, features = 2, 16, 32
    x = jax.random.normal(key, (batch, seq, features), dtype=jnp.float32)
    a_2 = jnp.ones((features,), dtype=jnp.float32)   # nn.Parameter(torch.ones)
    b_2 = jnp.zeros((features,), dtype=jnp.float32)  # nn.Parameter(torch.zeros)
    y = jax.block_until_ready(layer_norm(x, a_2, b_2, eps=1e-6))
    ref = _reference(x, a_2, b_2, 1e-6)
    assert jnp.allclose(y, ref, atol=2e-5, rtol=2e-5), "mismatch (packed path F=32)"

    # --- packed path with F=64 (g=2) and non-trivial gamma/beta
    k1 = jax.random.PRNGKey(1)
    x1 = jax.random.normal(k1, (4, 40, 64), dtype=jnp.float32)
    a1 = 0.5 + jax.random.uniform(jax.random.PRNGKey(10), (64,), dtype=jnp.float32)
    b1 = jax.random.normal(jax.random.PRNGKey(11), (64,), dtype=jnp.float32)
    y1 = jax.block_until_ready(layer_norm(x1, a1, b1, eps=1e-6))
    ref1 = _reference(x1, a1, b1, 1e-6)
    assert jnp.allclose(y1, ref1, atol=2e-5, rtol=2e-5), "mismatch (packed path F=64)"

    # --- generic path, f32, odd row count (full-extent block)
    k2 = jax.random.PRNGKey(2)
    x2 = jax.random.normal(k2, (2, 23, 256), dtype=jnp.float32)
    a2 = jnp.ones((256,), dtype=jnp.float32)
    b2 = jnp.zeros((256,), dtype=jnp.float32)
    y2 = jax.block_until_ready(layer_norm(x2, a2, b2, eps=1e-6))
    ref2 = _reference(x2, a2, b2, 1e-6)
    assert jnp.allclose(y2, ref2, atol=1e-5, rtol=1e-5), "mismatch (generic path)"

    # --- generic path with a multi-step grid (exercises the tiling/split logic)
    k3 = jax.random.PRNGKey(3)
    x3 = jax.random.normal(k3, (4, 512, 256), dtype=jnp.float32)
    y3 = jax.block_until_ready(layer_norm(x3, a2, b2, eps=1e-6))
    ref3 = _reference(x3, a2, b2, 1e-6)
    assert jnp.allclose(y3, ref3, atol=1e-5, rtol=1e-5), "mismatch (multi-step grid)"

    # --- bf16 input: all math in f32, cast only at the final store
    k4 = jax.random.PRNGKey(4)
    x4 = jax.random.normal(k4, (2, 20, 256), dtype=jnp.float32).astype(jnp.bfloat16)
    y4 = jax.block_until_ready(layer_norm(x4, a2, b2, eps=1e-6))
    ref4 = _reference(x4, a2, b2, 1e-6)
    assert jnp.allclose(y4.astype(jnp.float32), ref4, atol=1e-2, rtol=1e-2), \
        "mismatch (bf16 path)"

    print("KERNEL_OK")
</pallas_src>

<mosaic_0001>
module attributes {stable_mosaic.version = 11 : i64} {
  func.func @_ln_packed_kernel(%arg0: i32, %arg1: memref<8x128xf32, #tpu.memory_space<vmem>>, %arg2: memref<1x128xf32, #tpu.memory_space<vmem>>, %arg3: memref<1x128xf32, #tpu.memory_space<vmem>>, %arg4: memref<128x128xf32, #tpu.memory_space<vmem>>, %arg5: memref<8x128xf32, #tpu.memory_space<vmem>>) attributes {dimension_semantics = [#tpu.dimension_semantics<parallel>], iteration_bounds = array<i64: 1>, scalar_prefetch = 0 : i64, scratch_operands = 0 : i64, tpu.core_type = #tpu.core_type<tc>, window_params = [{transform_indices = @transform_0, window_bounds = array<i64: 8, 128>}, {pipeline_mode = #tpu.pipeline_mode<synchronous>, transform_indices = @transform_1, window_bounds = array<i64: 1, 128>}, {pipeline_mode = #tpu.pipeline_mode<synchronous>, transform_indices = @transform_2, window_bounds = array<i64: 1, 128>}, {pipeline_mode = #tpu.pipeline_mode<synchronous>, transform_indices = @transform_3, window_bounds = array<i64: 128, 128>}, {transform_indices = @transform_4, window_bounds = array<i64: 8, 128>}]} {
    %c0 = arith.constant 0 : index
    %c0_0 = arith.constant 0 : index
    %0 = vector.load %arg1[%c0, %c0_0] : memref<8x128xf32, #tpu.memory_space<vmem>>, vector<8x128xf32>
    %c0_1 = arith.constant 0 : index
    %c0_2 = arith.constant 0 : index
    %1 = vector.load %arg4[%c0_1, %c0_2] : memref<128x128xf32, #tpu.memory_space<vmem>>, vector<128x128xf32>
    %cst = arith.constant dense<0.000000e+00> : vector<8x128xf32>
    %2 = tpu.matmul %0, %1, %cst {dimension_numbers = #tpu.dot_dimension_numbers<[1], [0], [0], [1], [0, 0, 1, 1], [], []>} : vector<8x128xf32>, vector<128x128xf32>, vector<8x128xf32> -> vector<8x128xf32>
    %cst_3 = arith.constant 3.125000e-02 : f32
    %3 = vector.broadcast %cst_3 : f32 to vector<8x128xf32>
    %4 = arith.mulf %2, %3 : vector<8x128xf32>
    %5 = arith.subf %0, %4 : vector<8x128xf32>
    %6 = arith.mulf %5, %5 : vector<8x128xf32>
    %cst_4 = arith.constant dense<0.000000e+00> : vector<8x128xf32>
    %7 = tpu.matmul %6, %1, %cst_4 {dimension_numbers = #tpu.dot_dimension_numbers<[1], [0], [0], [1], [0, 0, 1, 1], [], []>} : vector<8x128xf32>, vector<128x128xf32>, vector<8x128xf32> -> vector<8x128xf32>
    %cst_5 = arith.constant 0.0322580636 : f32
    %8 = vector.broadcast %cst_5 : f32 to vector<8x128xf32>
    %9 = arith.mulf %7, %8 : vector<8x128xf32>
    %10 = math.sqrt %9 : vector<8x128xf32>
    %cst_6 = arith.constant 9.99999997E-7 : f32
    %11 = vector.broadcast %cst_6 : f32 to vector<8x128xf32>
    %12 = arith.addf %10, %11 : vector<8x128xf32>
    %13 = tpu.reciprocal %12 : vector<8x128xf32> -> vector<8x128xf32>
    %c0_7 = arith.constant 0 : index
    %c0_8 = arith.constant 0 : index
    %14 = vector.load %arg2[%c0_7, %c0_8] : memref<1x128xf32, #tpu.memory_space<vmem>>, vector<1x128xf32>
    %15 = vector.broadcast %14 : vector<1x128xf32> to vector<8x128xf32>
    %16 = arith.mulf %13, %15 : vector<8x128xf32>
    %17 = arith.mulf %5, %16 : vector<8x128xf32>
    %c0_9 = arith.constant 0 : index
    %c0_10 = arith.constant 0 : index
    %18 = vector.load %arg3[%c0_9, %c0_10] : memref<1x128xf32, #tpu.memory_space<vmem>>, vector<1x128xf32>
    %19 = vector.broadcast %18 : vector<1x128xf32> to vector<8x128xf32>
    %20 = arith.addf %17, %19 : vector<8x128xf32>
    %c0_11 = arith.constant 0 : index
    %c0_12 = arith.constant 0 : index
    %21 = vector.load %arg5[%c0_11, %c0_12] : memref<8x128xf32, #tpu.memory_space<vmem>>, vector<8x128xf32>
    tpu.vector_store %arg5[%c0_11, %c0_12], %20 {strides = array<i32>} : memref<8x128xf32, #tpu.memory_space<vmem>>, vector<8x128xf32>,
    return
  }
  func.func @transform_0(%arg0: i32) -> (i32, i32) {
    %c0_i32 = arith.constant 0 : i32
    %c0_i32_0 = arith.constant 0 : i32
    return %arg0, %c0_i32 : i32, i32
  }
  func.func @transform_1(%arg0: i32) -> (i32, i32) {
    %c0_i32 = arith.constant 0 : i32
    %c0_i32_0 = arith.constant 0 : i32
    %c0_i32_1 = arith.constant 0 : i32
    return %c0_i32, %c0_i32_0 : i32, i32
  }
  func.func @transform_2(%arg0: i32) -> (i32, i32) {
    %c0_i32 = arith.constant 0 : i32
    %c0_i32_0 = arith.constant 0 : i32
    %c0_i32_1 = arith.constant 0 : i32
    return %c0_i32, %c0_i32_0 : i32, i32
  }
  func.func @transform_3(%arg0: i32) -> (i32, i32) {
    %c0_i32 = arith.constant 0 : i32
    %c0_i32_0 = arith.constant 0 : i32
    %c0_i32_1 = arith.constant 0 : i32
    return %c0_i32, %c0_i32_0 : i32, i32
  }
  func.func @transform_4(%arg0: i32) -> (i32, i32) {
    %c0_i32 = arith.constant 0 : i32
    %c0_i32_0 = arith.constant 0 : i32
    return %arg0, %c0_i32 : i32, i32
  }
}

</mosaic_0001>

<bundles_post_ra>
// kernel: tpu_custom_call.1
= control target key start
LH: loop header
LB: loop body
LE: loop exit
PB: predicated region body
PF: predicated region fallthrough
CT: control target
= control target key end

     0   :  { %9 = vsyncpa [#allocation3], 0  ;;  %s568_s0 = inlined_call_operand.hbm [shape: f32[8,128], index: 0, kind: input, shape index: {}]   ;;  %s569_s1 = inlined_call_operand.vmem [shape: f32[1,128], index: 1, kind: input, shape index: {}]   ;;  %s570_s2 = inlined_call_operand.vmem [shape: f32[1,128], index: 2, kind: input, shape index: {}]   ;;  %s571_s3 = inlined_call_operand.hbm [shape: f32[128,128], index: 3, kind: input, shape index: {}]   ;;  %s572_s4 = inlined_call_operand.hbm [shape: f32[8,128], index: 4, kind: output, shape index: {}]  }
   0x1   :  { %10 = vsyncpa [#allocation6], 0 }
   0x2   :  { %11 = vsyncpa [#allocation4], 0  ;;  %s486_s15 = smov [#allocation2]   ;;  %s487_s17 = smov [#allocation5]  }
   0x3   :  { %s18_s16 = sshll.u32 %s486_s15, 4  ;;  %s31_s18 = sshll.u32 %s487_s17, 4  ;;  %s19_s16 = int_to_ptr.vmem [resolvable:$true] %s18_s16  ;;  %s519_s18 = int_to_ptr.vmem [resolvable:$true] %s31_s18 }
   0x4   :  { %s414_s21 = scalar_lea.hbm %s568_s0, 128 }
   0x5   :  { %p415_p0 = scmp.ne.s32.totalorder %s568_s0, %s414_s21  ;;  %p418_p1 = scmp.lt.u32.totalorder %s414_s21, %s568_s0 }
   0x7   :  { %p420_p2 = pnand %p418_p1, %p415_p0 }
   0x9   :  { %423 = shalt.err (!%p420_p2)
}
   0xa   :  { %s424_s26 = scalar_lea.vmem %s19_s16, 128  ;;  %p429_p4 = scmp.lt.s32.totalorder %s19_s16, %s19_s16 }
   0xb   :  { %p425_p3 = scmp.ne.s32.totalorder %s19_s16, %s424_s26  ;;  %p430_p5 = scmp.lt.s32.totalorder %s424_s26, %s424_s26 }
   0xd   :  { %p431_p6 = por %p430_p5, %p429_p4 }
   0xf   :  { %p432_p7 = pnand %p431_p6, %p425_p3 }
  0x11   :  { %435 = shalt.err (!%p432_p7)
}
  0x12   :  { %21 = dma.hbm_to_vmem [thread:$0]  %s568_s0, 128, %s19_s16, [#allocation3]  }
  0x13   :  { %s436_s5 = scalar_lea.hbm %s571_s3, 2048 }
  0x14   :  { %p437_p8 = scmp.ne.s32.totalorder %s571_s3, %s436_s5  ;;  %p440_p9 = scmp.lt.u32.totalorder %s436_s5, %s571_s3 }
  0x16   :  { %p442_p10 = pnand %p440_p9, %p437_p8 }
  0x18   :  { %445 = shalt.err (!%p442_p10)
}
  0x19   :  { %s446_s10 = scalar_lea.vmem %s519_s18, 2048  ;;  %p451_p12 = scmp.lt.s32.totalorder %s519_s18, %s519_s18 }
  0x1a   :  { %p447_p11 = scmp.ne.s32.totalorder %s519_s18, %s446_s10  ;;  %p452_p13 = scmp.lt.s32.totalorder %s446_s10, %s446_s10 }
  0x1c   :  { %p453_p0 = por %p452_p13, %p451_p12 }
  0x1e   :  { %p454_p1 = pnand %p453_p0, %p447_p11 }
  0x20   :  { %457 = shalt.err (!%p454_p1)
}
  0x21   :  { %s488_s0 = smov 128   ;;  %s489_s11 = smov 8  }
  0x22   :  { %37 = dma.hbm_to_vmem [thread:$0]  %s571_s3, 2048, %s519_s18, [#allocation6], %s488_s0, %s488_s0, %s489_s11  }
  0x23   :  { %480 = dma.done.wait [#allocation3], 128  }
  0x24   :  { %481 = vsyncadd [#allocation3], 4294967168 }
  0x25   :  { %482 = dma.done.wait [#allocation6], 2048  }
  0x26   :  { %483 = vsyncadd [#allocation6], 4294965248  ;;  %v490_v0 = vmov 0.0|0.0   ;;  %vm491_vm0 = vmmov 0   ;;  %v492_v1 = vmov 0.0   ;;  %v45_v2 = vld [vmem:[#allocation5] sm:$0xff] }
  0x27   :  { %354 = vmatprep.subr.bf16.mxu0 %v490_v0  ;;  %316 = vmatprep.mubr.msk.f32.mxu0 %vm491_vm0, %v492_v1  ;;  %v46_v3 = vld [vmem:[#allocation5 + $0x8] sm:$0xff]  ;;  %v47_v4 = vld [vmem:[#allocation5 + $0x10] sm:$0xff]  ;;  %v48_v6 = vld [vmem:[#allocation5 + $0x18] sm:$0xff]  ;;  %s493_s17 = smov [#allocation7]  }
  0x28   :  { %378 = vmatprep.subr.bf16.mxu1 %v490_v0  ;;  %351 = vmatprep.mubr.msk.f32.mxu1 %vm491_vm0, %v492_v1  ;;  %v355_v5 = vpack.c.bf16 %v46_v3, %v45_v2  ;;  %v358_v7 = vpack.c.bf16 %v48_v6, %v47_v4  ;;  %v49_v8 = vld [vmem:[#allocation5 + $0x20] sm:$0xff]  ;;  %v50_v9 = vld [vmem:[#allocation5 + $0x28] sm:$0xff]  ;;  %v51_v11 = vld [vmem:[#allocation5 + $0x30] sm:$0xff]  ;;  %s238_s18 = sshll.u32 %s493_s17, 4  ;;  %s239_s18 = int_to_ptr.vmem [resolvable:$true] %s238_s18 }
  0x29   :  { %v361_v10 = vpack.c.bf16 %v50_v9, %v49_v8  ;;  %v52_v12 = vld [vmem:[#allocation5 + $0x38] sm:$0xff]  ;;  %v53_v14 = vld [vmem:[#allocation5 + $0x40] sm:$0xff]  ;;  %v54_v15 = vld [vmem:[#allocation5 + $0x48] sm:$0xff]  ;;  %s458_s19 = scalar_lea.vmem %s239_s18, 128  ;;  %p463_p3 = scmp.lt.s32.totalorder %s239_s18, %s239_s18 }
  0x2a   :  { %356 = vmatpush3.bf16.msra.mxu0 %v355_v5  ;;  %380 = vmatpush3.bf16.msra.mxu1 %v355_v5  ;;  %v364_v13 = vpack.c.bf16 %v52_v12, %v51_v11  ;;  %v367_v16 = vpack.c.bf16 %v54_v15, %v53_v14  ;;  %v55_v17 = vld [vmem:[#allocation5 + $0x50] sm:$0xff]  ;;  %v56_v18 = vld [vmem:[#allocation5 + $0x58] sm:$0xff]  ;;  %v57_v20 = vld [vmem:[#allocation5 + $0x60] sm:$0xff]  ;;  %p459_p2 = scmp.ne.s32.totalorder %s239_s18, %s458_s19  ;;  %p464_p4 = scmp.lt.s32.totalorder %s458_s19, %s458_s19 }
  0x2b   :  { %357 = vmatprep.subr.bf16.mxu0 %v490_v0  ;;  %381 = vmatprep.subr.bf16.mxu1 %v490_v0  ;;  %v370_v19 = vpack.c.bf16 %v56_v18, %v55_v17  ;;  %v58_v21 = vld [vmem:[#allocation5 + $0x68] sm:$0xff]  ;;  %v59_v23 = vld [vmem:[#allocation5 + $0x70] sm:$0xff]  ;;  %v60_v24 = vld [vmem:[#allocation5 + $0x78] sm:$0xff] }
  0x2c   :  { %v373_v22 = vpack.c.bf16 %v58_v21, %v57_v20  ;;  %v376_v25 = vpack.c.bf16 %v60_v24, %v59_v23  ;;  %v44_v26 = vld [vmem:[#allocation2] sm:$0xff]  ;;  %p465_p5 = por %p464_p4, %p463_p3 }
  0x2d   :  { %v248_v41 = vld [vmem:[%s569_s1] ss:$0 sm:$0xff] }
  0x2e   :  { %359 = vmatpush3.bf16.msra.mxu0 %v358_v7  ;;  %383 = vmatpush3.bf16.msra.mxu1 %v358_v7  ;;  %v249_v44 = vld [vmem:[%s570_s2] ss:$0 sm:$0xff]  ;;  %p466_p6 = pnand %p465_p5, %p459_p2 }
  0x2f   :  { %360 = vmatprep.subr.bf16.mxu0 %v490_v0  ;;  %384 = vmatprep.subr.bf16.mxu1 %v490_v0 }
  0x32   :  { %362 = vmatpush3.bf16.msra.mxu0 %v361_v10  ;;  %386 = vmatpush3.bf16.msra.mxu1 %v361_v10 }
  0x33   :  { %363 = vmatprep.subr.bf16.mxu0 %v490_v0  ;;  %387 = vmatprep.subr.bf16.mxu1 %v490_v0 }
  0x36   :  { %365 = vmatpush3.bf16.msra.mxu0 %v364_v13  ;;  %389 = vmatpush3.bf16.msra.mxu1 %v364_v13 }
  0x37   :  { %366 = vmatprep.subr.bf16.mxu0 %v490_v0  ;;  %390 = vmatprep.subr.bf16.mxu1 %v490_v0 }
  0x3a   :  { %368 = vmatpush3.bf16.msra.mxu0 %v367_v16  ;;  %392 = vmatpush3.bf16.msra.mxu1 %v367_v16 }
  0x3b   :  { %369 = vmatprep.subr.bf16.mxu0 %v490_v0  ;;  %393 = vmatprep.subr.bf16.mxu1 %v490_v0 }
  0x3e   :  { %371 = vmatpush3.bf16.msra.mxu0 %v370_v19  ;;  %395 = vmatpush3.bf16.msra.mxu1 %v370_v19 }
  0x3f   :  { %372 = vmatprep.subr.bf16.mxu0 %v490_v0  ;;  %396 = vmatprep.subr.bf16.mxu1 %v490_v0 }
  0x42   :  { %374 = vmatpush3.bf16.msra.mxu0 %v373_v22  ;;  %398 = vmatpush3.bf16.msra.mxu1 %v373_v22 }
  0x43   :  { %375 = vmatprep.subr.bf16.mxu0 %v490_v0  ;;  %399 = vmatprep.subr.bf16.mxu1 %v490_v0 }
  0x46   :  { %377 = vmatpush3.bf16.msra.mxu0 %v376_v25  ;;  %401 = vmatpush3.bf16.msra.mxu1 %v376_v25 }
  0x49   :  { %317 = vmatmul.mubr.f32.vlgmr.msra.gmra.mrb[0].mxu0 %v44_v26 }
 0x11c   :  { %v127_v27 = vpop.f32.mrb[0].mxu0 }
 0x11d   :  { %v131_v28 = vmul.f32 0.03125, %v127_v27  ;;  %v318_v29 = vpop.f32.mrb[1].mxu0 }
 0x11f   :  { %v132_v30 = vsub.f32 %v44_v26, %v131_v28 }
 0x121   :  { %v133_v31 = vmul.f32 %v132_v30, %v132_v30 }
 0x123   :  { %352 = vmatmul.mubr.f32.vlgmr.msra.gmra.mrb[0].mxu1 %v133_v31 }
 0x1f6   :  { %v200_v32 = vpop.f32.mrb[0].mxu1 }
 0x1f7   :  { %v204_v33 = vmul.f32 0.032258064, %v200_v32  ;;  %v353_v34 = vpop.f32.mrb[1].mxu1 }
 0x1f9   :  { %410 = vrsqrt.f32 %v204_v33  ;;  %vm207_vm1 = vcmp.eq.f32.partialorder %v204_v33, inf  ;;  %v210_v37 = vand.u32 2147483648, %v204_v33  ;;  %vm209_vm2 = vcmp.eq.f32.partialorder %v204_v33, 0.0 }
 0x203   :  { %v411_v35 = vpop.eup %410 }
 0x204   :  { %v206_v36 = vmul.f32 %v411_v35, %v204_v33 }
 0x206   :  { %v208_v38 = vsel %vm207_vm1, %v204_v33, %v206_v36 }
 0x207   :  { %v211_v39 = vsel %vm209_vm2, %v210_v37, %v208_v38 }
 0x208   :  { %v212_v40 = vadd.f32 1e-06, %v211_v39 }
 0x20a   :  { %412 = vrcp.f32 %v212_v40 }
 0x214   :  { %v413_v42 = vpop.eup %412 }
 0x215   :  { %v221_v43 = vmul.f32 %v413_v42, %v248_v41 }
 0x217   :  { %v222_v45 = vmul.f32 %v221_v43, %v132_v30 }
 0x219   :  { %v230_v46 = vadd.f32 %v249_v44, %v222_v45 }
 0x21b   :  { %231 = vst [vmem:[#allocation7] sm:$0xff] %v230_v46 }
 0x21c   :  { %469 = shalt.err (!%p466_p6)
}
 0x21d   :  { %s470_s21 = scalar_lea.hbm %s572_s4, 128 }
 0x21e   :  { %p471_p7 = scmp.ne.s32.totalorder %s572_s4, %s470_s21  ;;  %p474_p8 = scmp.lt.u32.totalorder %s470_s21, %s572_s4 }
 0x220   :  { %p476_p9 = pnand %p474_p8, %p471_p7 }
 0x222   :  { %479 = shalt.err (!%p476_p9)
}
 0x223   :  { %241 = dma.vmem_to_hbm [thread:$0]  %s239_s18, 128, %s572_s4, [#allocation4]  }
 0x224   :  { %484 = dma.done.wait [#allocation4], 128  }
 0x225   :  { %485 = vsyncadd [#allocation4], 4294967168 }
 0x226   :  { %245 = vsyncpa [#allocation3], 1 }
 0x227   :  { %246 = vsyncpa [#allocation6], 1 }
 0x228   :  { %247 = vsyncpa [#allocation4], 1 }

</bundles_post_ra>
